<compile_context>
chip_gen: v7x
topology: tpu7x:2x2x1
jax: 0.10.0
libtpu: 0.0.40
codegen_flags: <defaults>
</compile_context>

<pallas_src>
import jax
import jax.numpy as jnp
from jax.experimental import pallas as pl
from jax.experimental.pallas import tpu as pltpu

EPS = 1e-5
LANE = 128
VMEM_LIMIT = 32 * 1024 * 1024     # explicit scoped-VMEM limit (ok on v5e/v6e/v7x)
VMEM_BUDGET = 8 * 1024 * 1024     # target double-buffered working set per step


def _round_up(x, m):
    return (x + m - 1) // m * m


def _pick_m_tile(k_pad, cout, m):
    """Largest lane-aligned M tile whose double-buffered working set fits."""
    m_cap = _round_up(m, LANE)
    for cand in (8192, 4096, 2048, 1024, 512, 256, 128):
        need = 2 * (k_pad * cand * 2      # bf16 patch tile
                    + cout * cand * 4     # f32 y tile
                    + cand * 4            # f32 mask tile
                    + cout * LANE * 4)    # f32 stats tile
        if need <= VMEM_BUDGET:
            return min(cand, m_cap)
    return min(128, m_cap)


def _conv_relu_stats_kernel(w_ref, p_ref, b_ref, msk_ref, y_ref, st_ref):
    # w_ref: (Cout, Kp) bf16   p_ref: (Kp, Mt) bf16   b_ref: (Cout, 1) f32
    # msk_ref: (1, Mt) f32     y_ref: (Cout, Mt) f32  st_ref: (Cout, LANE) f32
    y = jnp.dot(w_ref[...], p_ref[...], preferred_element_type=jnp.float32)
    y = jnp.maximum(y + b_ref[...], 0.0)              # conv bias + ReLU
    y_ref[...] = y
    ym = y * msk_ref[...]                             # exclude padded columns
    s = jnp.sum(ym, axis=-1, keepdims=True)           # per-channel sum   (Cout,1)
    ss = jnp.sum(ym * ym, axis=-1, keepdims=True)     # per-channel sum(y^2)
    lane = jax.lax.broadcasted_iota(jnp.int32, st_ref.shape, 1)
    st_ref[...] = jnp.where(lane == 0, s, 0.0) + jnp.where(lane == 1, ss, 0.0)


def _bn_apply_kernel(y_ref, sc_ref, sh_ref, o_ref):
    o_ref[...] = (y_ref[...] * sc_ref[...] + sh_ref[...]).astype(o_ref.dtype)


def _conv_relu_bn_layer(x_cnhw, w, b, gamma, beta, out_dtype):
    C, N, H, W = x_cnhw.shape
    Cout = w.shape[0]
    Ho = (H + 2 - 3) // 2 + 1
    Wo = (W + 2 - 3) // 2 + 1
    M = N * Ho * Wo
    K = C * 9
    Kp = _round_up(K, 16)
    Mt = _pick_m_tile(Kp, Cout, M)
    Mp = _round_up(M, Mt)
    nt = Mp // Mt

    # patches^T (K, M): channel-major rows (c, kh, kw) match the flattened
    # PyTorch weight layout; built from 9 strided shifted views. The CNHW
    # activation layout means no transposes of the activation itself.
    xp = jnp.pad(x_cnhw, ((0, 0), (0, 0), (1, 1), (1, 1)))
    views = [xp[:, :, kh:kh + 2 * Ho - 1:2, kw:kw + 2 * Wo - 1:2]
             for kh in range(3) for kw in range(3)]
    pt = jnp.stack(views, axis=1).reshape(K, M).astype(jnp.bfloat16)
    pt = jnp.pad(pt, ((0, Kp - K), (0, Mp - M)))

    w2 = jnp.pad(w.reshape(Cout, K).astype(jnp.bfloat16), ((0, 0), (0, Kp - K)))
    bias = b.reshape(Cout, 1).astype(jnp.float32)
    mask = (jnp.arange(Mp) < M).astype(jnp.float32).reshape(1, Mp)

    cparams = pltpu.CompilerParams(
        dimension_semantics=("parallel",), vmem_limit_bytes=VMEM_LIMIT)

    # Pass 1: conv + bias + ReLU (lane-dense y) + per-tile BN partial stats.
    y, stats = pl.pallas_call(
        _conv_relu_stats_kernel,
        out_shape=(jax.ShapeDtypeStruct((Cout, Mp), jnp.float32),
                   jax.ShapeDtypeStruct((nt, Cout, LANE), jnp.float32)),
        grid=(nt,),
        in_specs=[
            pl.BlockSpec((Cout, Kp), lambda i: (0, 0)),
            pl.BlockSpec((Kp, Mt), lambda i: (0, i)),
            pl.BlockSpec((Cout, 1), lambda i: (0, 0)),
            pl.BlockSpec((1, Mt), lambda i: (0, i)),
        ],
        out_specs=(
            pl.BlockSpec((Cout, Mt), lambda i: (0, i)),
            pl.BlockSpec((None, Cout, LANE), lambda i: (i, 0, 0)),
        ),
        compiler_params=cparams,
    )(w2, pt, bias, mask)

    # Tiny per-channel finalize (training-mode biased stats over the true M).
    ssum = jnp.sum(stats[:, :, 0], axis=0)
    ssq = jnp.sum(stats[:, :, 1], axis=0)
    mean = ssum / M
    var = jnp.maximum(ssq / M - mean * mean, 0.0)
    scale = gamma * jax.lax.rsqrt(var + EPS)
    shift = beta - mean * scale

    # Pass 2: apply y * scale + shift (lane-dense, tiled, parallel).
    out = pl.pallas_call(
        _bn_apply_kernel,
        out_shape=jax.ShapeDtypeStruct((Cout, Mp), out_dtype),
        grid=(nt,),
        in_specs=[
            pl.BlockSpec((Cout, Mt), lambda i: (0, i)),
            pl.BlockSpec((Cout, 1), lambda i: (0, 0)),
            pl.BlockSpec((Cout, 1), lambda i: (0, 0)),
        ],
        out_specs=pl.BlockSpec((Cout, Mt), lambda i: (0, i)),
        compiler_params=cparams,
    )(y, scale.reshape(Cout, 1), shift.reshape(Cout, 1))

    return out[:, :M].reshape(Cout, N, Ho, Wo)


def _make_params(key):
    """Deterministic synthetic parameters matching the module's shapes."""
    layer_io = [(3, 24), (24, 24), (24, 24), (24, 24)]
    params = []
    for li, (cin, cout) in enumerate(layer_io):
        kw, kb = jax.random.split(jax.random.fold_in(key, li))
        fan_in = cin * 9
        w = jax.random.normal(kw, (cout, cin, 3, 3), jnp.float32) * (
            (2.0 / fan_in) ** 0.5)
        b = jax.random.uniform(kb, (cout,), jnp.float32,
                               -1.0 / fan_in ** 0.5, 1.0 / fan_in ** 0.5)
        gamma = jnp.ones((cout,), jnp.float32)   # BatchNorm2d default init
        beta = jnp.zeros((cout,), jnp.float32)
        params.append((w, b, gamma, beta))
    return params


@jax.jit
def conv_input_model(img, params):
    # img: (N, 3, H, W) float32, NCHW at the module boundary (PyTorch convention).
    x = jnp.transpose(img, (1, 0, 2, 3))          # -> (C, N, H, W), once
    n_layers = len(params)
    for li, (w, b, gamma, beta) in enumerate(params):
        out_dtype = jnp.float32 if li == n_layers - 1 else jnp.bfloat16
        x = _conv_relu_bn_layer(x, w, b, gamma, beta, out_dtype)
    return jnp.transpose(x, (1, 0, 2, 3))         # -> NCHW, once


if __name__ == "__main__":
    key = jax.random.PRNGKey(0)
    k_img, k_par = jax.random.split(key)
    img = jax.random.normal(k_img, (2, 3, 16, 16), jnp.float32)  # NCHW
    params = _make_params(k_par)

    out = conv_input_model(img, params)
    out = jax.block_until_ready(out)
    assert out.shape == (2, 24, 1, 1), out.shape
    assert jnp.all(jnp.isfinite(out))
    print("KERNEL_OK")
</pallas_src>

<mosaic_0001>
module attributes {stable_mosaic.version = 11 : i64} {
  func.func @_conv_relu_stats_kernel(%arg0: i32, %arg1: memref<24x32xbf16, #tpu.memory_space<vmem>>, %arg2: memref<32x128xbf16, #tpu.memory_space<vmem>>, %arg3: memref<24x1xf32, #tpu.memory_space<vmem>>, %arg4: memref<1x128xf32, #tpu.memory_space<vmem>>, %arg5: memref<24x128xf32, #tpu.memory_space<vmem>>, %arg6: memref<1x24x128xf32, #tpu.memory_space<vmem>>) attributes {dimension_semantics = [#tpu.dimension_semantics<parallel>], iteration_bounds = array<i64: 1>, scalar_prefetch = 0 : i64, scratch_operands = 0 : i64, tpu.core_type = #tpu.core_type<tc>, window_params = [{pipeline_mode = #tpu.pipeline_mode<synchronous>, transform_indices = @transform_0, window_bounds = array<i64: 24, 32>}, {transform_indices = @transform_1, window_bounds = array<i64: 32, 128>}, {pipeline_mode = #tpu.pipeline_mode<synchronous>, transform_indices = @transform_2, window_bounds = array<i64: 24, 1>}, {transform_indices = @transform_3, window_bounds = array<i64: 1, 128>}, {transform_indices = @transform_4, window_bounds = array<i64: 24, 128>}, {transform_indices = @transform_5, window_bounds = array<i64: 1, 24, 128>}]} {
    %c0 = arith.constant 0 : index
    %c0_0 = arith.constant 0 : index
    %0 = vector.load %arg1[%c0, %c0_0] : memref<24x32xbf16, #tpu.memory_space<vmem>>, vector<24x32xbf16>
    %c0_1 = arith.constant 0 : index
    %c0_2 = arith.constant 0 : index
    %1 = vector.load %arg2[%c0_1, %c0_2] : memref<32x128xbf16, #tpu.memory_space<vmem>>, vector<32x128xbf16>
    %cst = arith.constant dense<0.000000e+00> : vector<24x128xf32>
    %2 = tpu.matmul %0, %1, %cst {dimension_numbers = #tpu.dot_dimension_numbers<[1], [0], [0], [1], [0, 0, 1, 1], [], []>} : vector<24x32xbf16>, vector<32x128xbf16>, vector<24x128xf32> -> vector<24x128xf32>
    %c0_3 = arith.constant 0 : index
    %c0_4 = arith.constant 0 : index
    %3 = vector.load %arg3[%c0_3, %c0_4] : memref<24x1xf32, #tpu.memory_space<vmem>>, vector<24x1xf32>
    %4 = vector.broadcast %3 : vector<24x1xf32> to vector<24x128xf32>
    %5 = arith.addf %2, %4 : vector<24x128xf32>
    %cst_5 = arith.constant 0.000000e+00 : f32
    %6 = vector.broadcast %cst_5 : f32 to vector<24x128xf32>
    %7 = arith.maximumf %5, %6 : vector<24x128xf32>
    %c0_6 = arith.constant 0 : index
    %c0_7 = arith.constant 0 : index
    %8 = vector.load %arg5[%c0_6, %c0_7] : memref<24x128xf32, #tpu.memory_space<vmem>>, vector<24x128xf32>
    tpu.vector_store %arg5[%c0_6, %c0_7], %7 {strides = array<i32>} : memref<24x128xf32, #tpu.memory_space<vmem>>, vector<24x128xf32>,
    %c0_8 = arith.constant 0 : index
    %c0_9 = arith.constant 0 : index
    %9 = vector.load %arg4[%c0_8, %c0_9] : memref<1x128xf32, #tpu.memory_space<vmem>>, vector<1x128xf32>
    %10 = vector.broadcast %9 : vector<1x128xf32> to vector<24x128xf32>
    %11 = arith.mulf %7, %10 : vector<24x128xf32>
    %cst_10 = arith.constant dense<0.000000e+00> : vector<24xf32>
    %12 = vector.multi_reduction <add>, %11, %cst_10 [1] : vector<24x128xf32> to vector<24xf32>
    %13 = vector.shape_cast %12 : vector<24xf32> to vector<24x1xf32>
    %14 = arith.mulf %11, %11 : vector<24x128xf32>
    %cst_11 = arith.constant dense<0.000000e+00> : vector<24xf32>
    %15 = vector.multi_reduction <add>, %14, %cst_11 [1] : vector<24x128xf32> to vector<24xf32>
    %16 = vector.shape_cast %15 : vector<24xf32> to vector<24x1xf32>
    %17 = tpu.iota {dimensions = array<i32: 1>} : vector<24x128xi32>
    %c0_i32 = arith.constant 0 : i32
    %18 = vector.broadcast %c0_i32 : i32 to vector<24x128xi32>
    %19 = arith.cmpi eq, %17, %18 : vector<24x128xi32>
    %cst_12 = arith.constant 0.000000e+00 : f32
    %20 = vector.shape_cast %13 : vector<24x1xf32> to vector<24x1xf32>
    %21 = vector.broadcast %20 : vector<24x1xf32> to vector<24x128xf32>
    %22 = vector.broadcast %cst_12 : f32 to vector<24x128xf32>
    %23 = arith.select %19, %21, %22 : vector<24x128xi1>, vector<24x128xf32>
    %c1_i32 = arith.constant 1 : i32
    %24 = vector.broadcast %c1_i32 : i32 to vector<24x128xi32>
    %25 = arith.cmpi eq, %17, %24 : vector<24x128xi32>
    %cst_13 = arith.constant 0.000000e+00 : f32
    %26 = vector.shape_cast %16 : vector<24x1xf32> to vector<24x1xf32>
    %27 = vector.broadcast %26 : vector<24x1xf32> to vector<24x128xf32>
    %28 = vector.broadcast %cst_13 : f32 to vector<24x128xf32>
    %29 = arith.select %25, %27, %28 : vector<24x128xi1>, vector<24x128xf32>
    %30 = arith.addf %23, %29 : vector<24x128xf32>
    %c0_14 = arith.constant 0 : index
    %c0_15 = arith.constant 0 : index
    %c0_16 = arith.constant 0 : index
    %31 = vector.load %arg6[%c0_14, %c0_15, %c0_16] : memref<1x24x128xf32, #tpu.memory_space<vmem>>, vector<1x24x128xf32>
    %32 = vector.shape_cast %31 : vector<1x24x128xf32> to vector<24x128xf32>
    %33 = vector.shape_cast %30 : vector<24x128xf32> to vector<1x24x128xf32>
    tpu.vector_store %arg6[%c0_14, %c0_15, %c0_16], %33 {strides = array<i32>} : memref<1x24x128xf32, #tpu.memory_space<vmem>>, vector<1x24x128xf32>,
    return
  }
  func.func @transform_0(%arg0: i32) -> (i32, i32) {
    %c0_i32 = arith.constant 0 : i32
    %c0_i32_0 = arith.constant 0 : i32
    %c0_i32_1 = arith.constant 0 : i32
    return %c0_i32, %c0_i32_0 : i32, i32
  }
  func.func @transform_1(%arg0: i32) -> (i32, i32) {
    %c0_i32 = arith.constant 0 : i32
    %c0_i32_0 = arith.constant 0 : i32
    return %c0_i32, %arg0 : i32, i32
  }
  func.func @transform_2(%arg0: i32) -> (i32, i32) {
    %c0_i32 = arith.constant 0 : i32
    %c0_i32_0 = arith.constant 0 : i32
    %c0_i32_1 = arith.constant 0 : i32
    return %c0_i32, %c0_i32_0 : i32, i32
  }
  func.func @transform_3(%arg0: i32) -> (i32, i32) {
    %c0_i32 = arith.constant 0 : i32
    %c0_i32_0 = arith.constant 0 : i32
    return %c0_i32, %arg0 : i32, i32
  }
  func.func @transform_4(%arg0: i32) -> (i32, i32) {
    %c0_i32 = arith.constant 0 : i32
    %c0_i32_0 = arith.constant 0 : i32
    return %c0_i32, %arg0 : i32, i32
  }
  func.func @transform_5(%arg0: i32) -> (i32, i32, i32) {
    %c0_i32 = arith.constant 0 : i32
    %c0_i32_0 = arith.constant 0 : i32
    %c0_i32_1 = arith.constant 0 : i32
    return %arg0, %c0_i32, %c0_i32_0 : i32, i32, i32
  }
}

module attributes {stable_mosaic.version = 11 : i64} {
  func.func @_bn_apply_kernel(%arg0: i32, %arg1: memref<24x128xf32, #tpu.memory_space<vmem>>, %arg2: memref<24x1xf32, #tpu.memory_space<vmem>>, %arg3: memref<24x1xf32, #tpu.memory_space<vmem>>, %arg4: memref<24x128xbf16, #tpu.memory_space<vmem>>) attributes {dimension_semantics = [#tpu.dimension_semantics<parallel>], iteration_bounds = array<i64: 1>, scalar_prefetch = 0 : i64, scratch_operands = 0 : i64, tpu.core_type = #tpu.core_type<tc>, window_params = [{transform_indices = @transform_0, window_bounds = array<i64: 24, 128>}, {pipeline_mode = #tpu.pipeline_mode<synchronous>, transform_indices = @transform_1, window_bounds = array<i64: 24, 1>}, {pipeline_mode = #tpu.pipeline_mode<synchronous>, transform_indices = @transform_2, window_bounds = array<i64: 24, 1>}, {transform_indices = @transform_3, window_bounds = array<i64: 24, 128>}]} {
    %c0 = arith.constant 0 : index
    %c0_0 = arith.constant 0 : index
    %0 = vector.load %arg1[%c0, %c0_0] : memref<24x128xf32, #tpu.memory_space<vmem>>, vector<24x128xf32>
    %c0_1 = arith.constant 0 : index
    %c0_2 = arith.constant 0 : index
    %1 = vector.load %arg2[%c0_1, %c0_2] : memref<24x1xf32, #tpu.memory_space<vmem>>, vector<24x1xf32>
    %2 = vector.broadcast %1 : vector<24x1xf32> to vector<24x128xf32>
    %3 = arith.mulf %0, %2 : vector<24x128xf32>
    %c0_3 = arith.constant 0 : index
    %c0_4 = arith.constant 0 : index
    %4 = vector.load %arg3[%c0_3, %c0_4] : memref<24x1xf32, #tpu.memory_space<vmem>>, vector<24x1xf32>
    %5 = vector.broadcast %4 : vector<24x1xf32> to vector<24x128xf32>
    %6 = arith.addf %3, %5 : vector<24x128xf32>
    %7 = arith.truncf %6 : vector<24x128xf32> to vector<24x128xbf16>
    %c0_5 = arith.constant 0 : index
    %c0_6 = arith.constant 0 : index
    %8 = vector.load %arg4[%c0_5, %c0_6] : memref<24x128xbf16, #tpu.memory_space<vmem>>, vector<24x128xbf16>
    tpu.vector_store %arg4[%c0_5, %c0_6], %7 {strides = array<i32>} : memref<24x128xbf16, #tpu.memory_space<vmem>>, vector<24x128xbf16>,
    return
  }
  func.func @transform_0(%arg0: i32) -> (i32, i32) {
    %c0_i32 = arith.constant 0 : i32
    %c0_i32_0 = arith.constant 0 : i32
    return %c0_i32, %arg0 : i32, i32
  }
  func.func @transform_1(%arg0: i32) -> (i32, i32) {
    %c0_i32 = arith.constant 0 : i32
    %c0_i32_0 = arith.constant 0 : i32
    %c0_i32_1 = arith.constant 0 : i32
    return %c0_i32, %c0_i32_0 : i32, i32
  }
  func.func @transform_2(%arg0: i32) -> (i32, i32) {
    %c0_i32 = arith.constant 0 : i32
    %c0_i32_0 = arith.constant 0 : i32
    %c0_i32_1 = arith.constant 0 : i32
    return %c0_i32, %c0_i32_0 : i32, i32
  }
  func.func @transform_3(%arg0: i32) -> (i32, i32) {
    %c0_i32 = arith.constant 0 : i32
    %c0_i32_0 = arith.constant 0 : i32
    return %c0_i32, %arg0 : i32, i32
  }
}

module attributes {stable_mosaic.version = 11 : i64} {
  func.func @_conv_relu_stats_kernel(%arg0: i32, %arg1: memref<24x224xbf16, #tpu.memory_space<vmem>>, %arg2: memref<224x128xbf16, #tpu.memory_space<vmem>>, %arg3: memref<24x1xf32, #tpu.memory_space<vmem>>, %arg4: memref<1x128xf32, #tpu.memory_space<vmem>>, %arg5: memref<24x128xf32, #tpu.memory_space<vmem>>, %arg6: memref<1x24x128xf32, #tpu.memory_space<vmem>>) attributes {dimension_semantics = [#tpu.dimension_semantics<parallel>], iteration_bounds = array<i64: 1>, scalar_prefetch = 0 : i64, scratch_operands = 0 : i64, tpu.core_type = #tpu.core_type<tc>, window_params = [{pipeline_mode = #tpu.pipeline_mode<synchronous>, transform_indices = @transform_0, window_bounds = array<i64: 24, 224>}, {transform_indices = @transform_1, window_bounds = array<i64: 224, 128>}, {pipeline_mode = #tpu.pipeline_mode<synchronous>, transform_indices = @transform_2, window_bounds = array<i64: 24, 1>}, {transform_indices = @transform_3, window_bounds = array<i64: 1, 128>}, {transform_indices = @transform_4, window_bounds = array<i64: 24, 128>}, {transform_indices = @transform_5, window_bounds = array<i64: 1, 24, 128>}]} {
    %c0 = arith.constant 0 : index
    %c0_0 = arith.constant 0 : index
    %0 = vector.load %arg1[%c0, %c0_0] : memref<24x224xbf16, #tpu.memory_space<vmem>>, vector<24x224xbf16>
    %c0_1 = arith.constant 0 : index
    %c0_2 = arith.constant 0 : index
    %1 = vector.load %arg2[%c0_1, %c0_2] : memref<224x128xbf16, #tpu.memory_space<vmem>>, vector<224x128xbf16>
    %cst = arith.constant dense<0.000000e+00> : vector<24x128xf32>
    %2 = tpu.matmul %0, %1, %cst {dimension_numbers = #tpu.dot_dimension_numbers<[1], [0], [0], [1], [0, 0, 1, 1], [], []>} : vector<24x224xbf16>, vector<224x128xbf16>, vector<24x128xf32> -> vector<24x128xf32>
    %c0_3 = arith.constant 0 : index
    %c0_4 = arith.constant 0 : index
    %3 = vector.load %arg3[%c0_3, %c0_4] : memref<24x1xf32, #tpu.memory_space<vmem>>, vector<24x1xf32>
    %4 = vector.broadcast %3 : vector<24x1xf32> to vector<24x128xf32>
    %5 = arith.addf %2, %4 : vector<24x128xf32>
    %cst_5 = arith.constant 0.000000e+00 : f32
    %6 = vector.broadcast %cst_5 : f32 to vector<24x128xf32>
    %7 = arith.maximumf %5, %6 : vector<24x128xf32>
    %c0_6 = arith.constant 0 : index
    %c0_7 = arith.constant 0 : index
    %8 = vector.load %arg5[%c0_6, %c0_7] : memref<24x128xf32, #tpu.memory_space<vmem>>, vector<24x128xf32>
    tpu.vector_store %arg5[%c0_6, %c0_7], %7 {strides = array<i32>} : memref<24x128xf32, #tpu.memory_space<vmem>>, vector<24x128xf32>,
    %c0_8 = arith.constant 0 : index
    %c0_9 = arith.constant 0 : index
    %9 = vector.load %arg4[%c0_8, %c0_9] : memref<1x128xf32, #tpu.memory_space<vmem>>, vector<1x128xf32>
    %10 = vector.broadcast %9 : vector<1x128xf32> to vector<24x128xf32>
    %11 = arith.mulf %7, %10 : vector<24x128xf32>
    %cst_10 = arith.constant dense<0.000000e+00> : vector<24xf32>
    %12 = vector.multi_reduction <add>, %11, %cst_10 [1] : vector<24x128xf32> to vector<24xf32>
    %13 = vector.shape_cast %12 : vector<24xf32> to vector<24x1xf32>
    %14 = arith.mulf %11, %11 : vector<24x128xf32>
    %cst_11 = arith.constant dense<0.000000e+00> : vector<24xf32>
    %15 = vector.multi_reduction <add>, %14, %cst_11 [1] : vector<24x128xf32> to vector<24xf32>
    %16 = vector.shape_cast %15 : vector<24xf32> to vector<24x1xf32>
    %17 = tpu.iota {dimensions = array<i32: 1>} : vector<24x128xi32>
    %c0_i32 = arith.constant 0 : i32
    %18 = vector.broadcast %c0_i32 : i32 to vector<24x128xi32>
    %19 = arith.cmpi eq, %17, %18 : vector<24x128xi32>
    %cst_12 = arith.constant 0.000000e+00 : f32
    %20 = vector.shape_cast %13 : vector<24x1xf32> to vector<24x1xf32>
    %21 = vector.broadcast %20 : vector<24x1xf32> to vector<24x128xf32>
    %22 = vector.broadcast %cst_12 : f32 to vector<24x128xf32>
    %23 = arith.select %19, %21, %22 : vector<24x128xi1>, vector<24x128xf32>
    %c1_i32 = arith.constant 1 : i32
    %24 = vector.broadcast %c1_i32 : i32 to vector<24x128xi32>
    %25 = arith.cmpi eq, %17, %24 : vector<24x128xi32>
    %cst_13 = arith.constant 0.000000e+00 : f32
    %26 = vector.shape_cast %16 : vector<24x1xf32> to vector<24x1xf32>
    %27 = vector.broadcast %26 : vector<24x1xf32> to vector<24x128xf32>
    %28 = vector.broadcast %cst_13 : f32 to vector<24x128xf32>
    %29 = arith.select %25, %27, %28 : vector<24x128xi1>, vector<24x128xf32>
    %30 = arith.addf %23, %29 : vector<24x128xf32>
    %c0_14 = arith.constant 0 : index
    %c0_15 = arith.constant 0 : index
    %c0_16 = arith.constant 0 : index
    %31 = vector.load %arg6[%c0_14, %c0_15, %c0_16] : memref<1x24x128xf32, #tpu.memory_space<vmem>>, vector<1x24x128xf32>
    %32 = vector.shape_cast %31 : vector<1x24x128xf32> to vector<24x128xf32>
    %33 = vector.shape_cast %30 : vector<24x128xf32> to vector<1x24x128xf32>
    tpu.vector_store %arg6[%c0_14, %c0_15, %c0_16], %33 {strides = array<i32>} : memref<1x24x128xf32, #tpu.memory_space<vmem>>, vector<1x24x128xf32>,
    return
  }
  func.func @transform_0(%arg0: i32) -> (i32, i32) {
    %c0_i32 = arith.constant 0 : i32
    %c0_i32_0 = arith.constant 0 : i32
    %c0_i32_1 = arith.constant 0 : i32
    return %c0_i32, %c0_i32_0 : i32, i32
  }
  func.func @transform_1(%arg0: i32) -> (i32, i32) {
    %c0_i32 = arith.constant 0 : i32
    %c0_i32_0 = arith.constant 0 : i32
    return %c0_i32, %arg0 : i32, i32
  }
  func.func @transform_2(%arg0: i32) -> (i32, i32) {
    %c0_i32 = arith.constant 0 : i32
    %c0_i32_0 = arith.constant 0 : i32
    %c0_i32_1 = arith.constant 0 : i32
    return %c0_i32, %c0_i32_0 : i32, i32
  }
  func.func @transform_3(%arg0: i32) -> (i32, i32) {
    %c0_i32 = arith.constant 0 : i32
    %c0_i32_0 = arith.constant 0 : i32
    return %c0_i32, %arg0 : i32, i32
  }
  func.func @transform_4(%arg0: i32) -> (i32, i32) {
    %c0_i32 = arith.constant 0 : i32
    %c0_i32_0 = arith.constant 0 : i32
    return %c0_i32, %arg0 : i32, i32
  }
  func.func @transform_5(%arg0: i32) -> (i32, i32, i32) {
    %c0_i32 = arith.constant 0 : i32
    %c0_i32_0 = arith.constant 0 : i32
    %c0_i32_1 = arith.constant 0 : i32
    return %arg0, %c0_i32, %c0_i32_0 : i32, i32, i32
  }
}

module attributes {stable_mosaic.version = 11 : i64} {
  func.func @_bn_apply_kernel(%arg0: i32, %arg1: memref<24x128xf32, #tpu.memory_space<vmem>>, %arg2: memref<24x1xf32, #tpu.memory_space<vmem>>, %arg3: memref<24x1xf32, #tpu.memory_space<vmem>>, %arg4: memref<24x128xf32, #tpu.memory_space<vmem>>) attributes {dimension_semantics = [#tpu.dimension_semantics<parallel>], iteration_bounds = array<i64: 1>, scalar_prefetch = 0 : i64, scratch_operands = 0 : i64, tpu.core_type = #tpu.core_type<tc>, window_params = [{transform_indices = @transform_0, window_bounds = array<i64: 24, 128>}, {pipeline_mode = #tpu.pipeline_mode<synchronous>, transform_indices = @transform_1, window_bounds = array<i64: 24, 1>}, {pipeline_mode = #tpu.pipeline_mode<synchronous>, transform_indices = @transform_2, window_bounds = array<i64: 24, 1>}, {transform_indices = @transform_3, window_bounds = array<i64: 24, 128>}]} {
    %c0 = arith.constant 0 : index
    %c0_0 = arith.constant 0 : index
    %0 = vector.load %arg1[%c0, %c0_0] : memref<24x128xf32, #tpu.memory_space<vmem>>, vector<24x128xf32>
    %c0_1 = arith.constant 0 : index
    %c0_2 = arith.constant 0 : index
    %1 = vector.load %arg2[%c0_1, %c0_2] : memref<24x1xf32, #tpu.memory_space<vmem>>, vector<24x1xf32>
    %2 = vector.broadcast %1 : vector<24x1xf32> to vector<24x128xf32>
    %3 = arith.mulf %0, %2 : vector<24x128xf32>
    %c0_3 = arith.constant 0 : index
    %c0_4 = arith.constant 0 : index
    %4 = vector.load %arg3[%c0_3, %c0_4] : memref<24x1xf32, #tpu.memory_space<vmem>>, vector<24x1xf32>
    %5 = vector.broadcast %4 : vector<24x1xf32> to vector<24x128xf32>
    %6 = arith.addf %3, %5 : vector<24x128xf32>
    %c0_5 = arith.constant 0 : index
    %c0_6 = arith.constant 0 : index
    %7 = vector.load %arg4[%c0_5, %c0_6] : memref<24x128xf32, #tpu.memory_space<vmem>>, vector<24x128xf32>
    tpu.vector_store %arg4[%c0_5, %c0_6], %6 {strides = array<i32>} : memref<24x128xf32, #tpu.memory_space<vmem>>, vector<24x128xf32>,
    return
  }
  func.func @transform_0(%arg0: i32) -> (i32, i32) {
    %c0_i32 = arith.constant 0 : i32
    %c0_i32_0 = arith.constant 0 : i32
    return %c0_i32, %arg0 : i32, i32
  }
  func.func @transform_1(%arg0: i32) -> (i32, i32) {
    %c0_i32 = arith.constant 0 : i32
    %c0_i32_0 = arith.constant 0 : i32
    %c0_i32_1 = arith.constant 0 : i32
    return %c0_i32, %c0_i32_0 : i32, i32
  }
  func.func @transform_2(%arg0: i32) -> (i32, i32) {
    %c0_i32 = arith.constant 0 : i32
    %c0_i32_0 = arith.constant 0 : i32
    %c0_i32_1 = arith.constant 0 : i32
    return %c0_i32, %c0_i32_0 : i32, i32
  }
  func.func @transform_3(%arg0: i32) -> (i32, i32) {
    %c0_i32 = arith.constant 0 : i32
    %c0_i32_0 = arith.constant 0 : i32
    return %c0_i32, %arg0 : i32, i32
  }
}

</mosaic_0001>

<bundles_post_ra>
// kernel: conv_input_model.9
= control target key start
LH: loop header
LB: loop body
LE: loop exit
PB: predicated region body
PF: predicated region fallthrough
CT: control target
= control target key end

     0   :  { %v93_v0 = vmov 0   ;;  %s147_s1 = inlined_call_operand.vmem [shape: f32[24,1], index: 1, kind: input, shape index: {}]   ;;  %s148_s2 = inlined_call_operand.vmem [shape: f32[24,1], index: 2, kind: input, shape index: {}]   ;;  %s149_s0 = inlined_call_operand.vmem [shape: f32[24,128], index: 0, kind: input, shape index: {}]   ;;  %s150_s3 = inlined_call_operand.vmem [shape: bf16[24,128], index: 3, kind: output, shape index: {}]  }
   0x1   :  { %92 = vset.pattern.permute.xlu1 %v93_v0  ;;  %91 = vset.pattern.permute.xlu0 %v93_v0  ;;  %v19_v1 = vld [vmem:[%s147_s1 + $0x10] sm:$0xff]  ;;  %v17_v2 = vld [vmem:[%s147_s1] sm:$0xff]  ;;  %v18_v4 = vld [vmem:[%s147_s1 + $0x8] sm:$0xff] }
   0x2   :  { %32 = vperm.xlu1 %92, %v19_v1   ;;  %22 = vperm.xlu0 %91, %v17_v2   ;;  %v38_v3 = vld [vmem:[%s148_s2] sm:$0xff]  ;;  %v40_v5 = vld [vmem:[%s148_s2 + $0x10] sm:$0xff]  ;;  %v39_v6 = vld [vmem:[%s148_s2 + $0x8] sm:$0xff] }
   0x3   :  { %v16_v9 = vld [vmem:[%s149_s0 + $0x10] sm:$0xff]  ;;  %v14_v10 = vld [vmem:[%s149_s0] sm:$0xff]  ;;  %v15_v13 = vld [vmem:[%s149_s0 + $0x8] sm:$0xff] }
   0x6   :  { %43 = vperm.xlu1 %92, %v38_v3   ;;  %27 = vperm.xlu0 %91, %v18_v4  }
   0xa   :  { %53 = vperm.xlu1 %92, %v40_v5   ;;  %48 = vperm.xlu0 %91, %v39_v6  }
  0x81   :  { %v33_v7 = vpop.permute.xlu1 %32  ;;  %v23_v8 = vpop.permute.xlu0 %22 }
  0x82   :  { %v37_v14 = vmul.f32 %v33_v7, %v16_v9  ;;  %v35_v15 = vmul.f32 %v23_v8, %v14_v10 }
  0x85   :  { %v44_v11 = vpop.permute.xlu1 %43  ;;  %v28_v12 = vpop.permute.xlu0 %27 }
  0x86   :  { %v36_v16 = vmul.f32 %v28_v12, %v15_v13  ;;  %v56_v19 = vadd.f32 %v44_v11, %v35_v15 }
  0x89   :  { %v54_v17 = vpop.permute.xlu1 %53  ;;  %v49_v18 = vpop.permute.xlu0 %48 }
  0x8a   :  { %v58_v20 = vadd.f32 %v54_v17, %v37_v14  ;;  %v57_v21 = vadd.f32 %v49_v18, %v36_v16 }
  0x8c   :  { %v84_v22 = vpack.c.bf16 %v58_v20, %v58_v20  ;;  %v88_v23 = vpack.c.bf16 %v57_v21, %v56_v19 }
  0x8e   :  { %74 = vst [vmem:[%s150_s3 + $0x8] sm:$0xf] %v84_v22  ;;  %89 = vst [vmem:[%s150_s3] sm:$0xff] %v88_v23  }

// kernel: conv_input_model.8
= control target key start
LH: loop header
LB: loop body
LE: loop exit
PB: predicated region body
PF: predicated region fallthrough
CT: control target
= control target key end

     0   :  { %v201_v1 = vmov 0   ;;  %vm65_vm0 = vcmask 261120   ;;  %v151_v28 = vlaneseq  ;;  %s274_s1 = inlined_call_operand.vmem [shape: bf16[32,128], index: 1, kind: input, shape index: {}]   ;;  %s275_s0 = inlined_call_operand.vmem [shape: bf16[24,32], index: 0, kind: input, shape index: {}]   ;;  %s276_s2 = inlined_call_operand.vmem [shape: f32[24,1], index: 2, kind: input, shape index: {}]   ;;  %s277_s3 = inlined_call_operand.vmem [shape: f32[1,128], index: 3, kind: input, shape index: {}]   ;;  %s278_s4 = inlined_call_operand.vmem [shape: f32[24,128], index: 4, kind: output, shape index: {0}]   ;;  %s279_s5 = inlined_call_operand.vmem [shape: f32[1,24,128], index: 5, kind: output, shape index: {1}]  }
   0x1   :  { %v197_v0 = vld [vmem:[%s274_s1] sm:$0xff]   ;;  %195 = vset.pattern.permute.xlu0 %v201_v1  ;;  %196 = vset.pattern.permute.xlu1 %v201_v1  ;;  %v198_v2 = vld [vmem:[%s274_s1 + $0x8] sm:$0xff]   ;;  %v29_v5 = vld [vmem:[%s276_s2 + $0x10] sm:$0xff] }
   0x2   :  { %186 = vmatprep.subr.bf16.mxu0 %v197_v0  ;;  %v199_v3 = vld [vmem:[%s275_s0] sm:$0xff]   ;;  %42 = vperm.xlu1 %196, %v29_v5   ;;  %v28_v6 = vld [vmem:[%s276_s2 + $0x8] sm:$0xff]  ;;  %v152_v29 = vand.u32 127, %v151_v28 }
   0x3   :  { %187 = vmatpush3.bf16.msra.mxu0 %v197_v0  ;;  %v27_v4 = vld [vmem:[%s276_s2] sm:$0xff]  ;;  %190 = vmatprep.mubr.msk.bf16.mxu0 %vm65_vm0, %v199_v3  ;;  %v200_v7 = vld [vmem:[%s275_s0 + $0x8] ss:$0 sps:$4 sm:$0xff]  }
   0x4   :  { %188 = vmatprep.subr.bf16.mxu0 %v198_v2  ;;  %32 = vperm.xlu0 %195, %v27_v4   ;;  %v181_v15 = vld [vmem:[%s277_s3] ss:$0 sm:$0xff]  ;;  %vm153_vm1 = vcmp.eq.s32.totalorder %v152_v29, 0  ;;  %vm157_vm2 = vcmp.eq.s32.totalorder %v152_v29, 1 }
   0x7   :  { %189 = vmatpush3.bf16.msra.mxu0 %v198_v2 }
   0x8   :  { %37 = vperm.xlu0 %195, %v28_v6  }
   0xa   :  { %191 = vmatmul.mubr.msk.bf16.vlgmr.msra.gmra.mrb[0].mxu0 %vm65_vm0, %v200_v7 }
  0x81   :  { %v43_v9 = vpop.permute.xlu1 %42 }
  0x83   :  { %v33_v8 = vpop.permute.xlu0 %32 }
  0x87   :  { %v38_v17 = vpop.permute.xlu0 %37 }
  0xdd   :  { %v192_v10 = vpop.f32.mrb[0].mxu0 }
  0xde   :  { %v115_v11 = vadd.f32 %v192_v10, %v43_v9  ;;  %v106_v12 = vpop.f32.mrb[1].mxu0 }
  0xdf   :  { %v107_v13 = vadd.f32 %v106_v12, %v33_v8  ;;  %v193_v14 = vpop.f32.mrb[2].mxu0 }
  0xe0   :  { %v122_v16 = vmax.f32 %v115_v11, 0.0  ;;  %v109_v18 = vpop.f32.mrb[3].mxu0 }
  0xe1   :  { %v120_v19 = vmax.f32 %v107_v13, 0.0  ;;  %v110_v20 = vadd.f32 %v109_v18, %v38_v17 }
  0xe2   :  { %125 = vst [vmem:[%s278_s4 + $0x10] sm:$0xff] %v122_v16  ;;  %v135_v21 = vmul.f32 %v181_v15, %v122_v16 }
  0xe3   :  { %123 = vst [vmem:[%s278_s4] sm:$0xff] %v120_v19  ;;  %v121_v22 = vmax.f32 %v110_v20, 0.0  ;;  %v133_v23 = vmul.f32 %v181_v15, %v120_v19 }
  0xe4   :  { %140 = vadd.xlane.f32.xlu0 %v135_v21  ;;  %v144_v27 = vmul.f32 %v135_v21, %v135_v21 }
  0xe5   :  { %124 = vst [vmem:[%s278_s4 + $0x8] sm:$0xff] %v121_v22  ;;  %136 = vadd.xlane.f32.xlu1 %v133_v23  ;;  %v134_v24 = vmul.f32 %v181_v15, %v121_v22  ;;  %v142_v25 = vmul.f32 %v133_v23, %v133_v23 }
  0xe7   :  { %v143_v26 = vmul.f32 %v134_v24, %v134_v24 }
  0xe8   :  { %138 = vadd.xlane.f32.xlu0 %v134_v24 }
  0xe9   :  { %145 = vadd.xlane.f32.xlu1 %v142_v25 }
  0xec   :  { %147 = vadd.xlane.f32.xlu0 %v143_v26 }
  0xed   :  { %149 = vadd.xlane.f32.xlu1 %v144_v27 }
 0x171   :  { %v141_v30 = vpop.xlane.xlu0 %140 }
 0x172   :  { %v137_v31 = vpop.xlane.xlu1 %136  ;;  %v156_v41 = vsel %vm153_vm1, %v141_v30, 0.0 }
 0x173   :  { %v154_v34 = vsel %vm153_vm1, %v137_v31, 0.0 }
 0x175   :  { %v139_v32 = vpop.xlane.xlu0 %138 }
 0x176   :  { %v146_v33 = vpop.xlane.xlu1 %145  ;;  %v155_v38 = vsel %vm153_vm1, %v139_v32, 0.0 }
 0x177   :  { %v158_v35 = vsel %vm157_vm2, %v146_v33, 0.0 }
 0x178   :  { %v161_v36 = vadd.f32 %v158_v35, %v154_v34 }
 0x179   :  { %v148_v37 = vpop.xlane.xlu0 %147 }
 0x17a   :  { %164 = vst [vmem:[%s279_s5] sm:$0xff] %v161_v36  ;;  %v159_v39 = vsel %vm157_vm2, %v148_v37, 0.0  ;;  %v150_v40 = vpop.xlane.xlu1 %149 }
 0x17b   :  { %v162_v42 = vadd.f32 %v159_v39, %v155_v38  ;;  %v160_v43 = vsel %vm157_vm2, %v150_v40, 0.0 }
 0x17c   :  { %v163_v44 = vadd.f32 %v160_v43, %v156_v41 }
 0x17d   :  { %165 = vst [vmem:[%s279_s5 + $0x8] sm:$0xff] %v162_v42 }
 0x17e   :  { %166 = vst [vmem:[%s279_s5 + $0x10] sm:$0xff] %v163_v44 }

// kernel: conv_input_model.10
= control target key start
LH: loop header
LB: loop body
LE: loop exit
PB: predicated region body
PF: predicated region fallthrough
CT: control target
= control target key end

     0   :  { %v349_v0 = vmov 0   ;;  %vm168_vm0 = vcmask 785408   ;;  %v254_v47 = vlaneseq  ;;  %s493_s1 = inlined_call_operand.vmem [shape: bf16[224,128], index: 1, kind: input, shape index: {}]   ;;  %s494_s0 = inlined_call_operand.vmem [shape: bf16[24,224], index: 0, kind: input, shape index: {}]   ;;  %s495_s2 = inlined_call_operand.vmem [shape: f32[24,1], index: 2, kind: input, shape index: {}]   ;;  %s496_s3 = inlined_call_operand.vmem [shape: f32[1,128], index: 3, kind: input, shape index: {}]   ;;  %s497_s4 = inlined_call_operand.vmem [shape: f32[24,128], index: 4, kind: output, shape index: {0}]   ;;  %s498_s5 = inlined_call_operand.vmem [shape: f32[1,24,128], index: 5, kind: output, shape index: {1}]  }
   0x1   :  { %175 = vmatprep.subr.bf16.mxu0 %v349_v0  ;;  %299 = vmatprep.subr.bf16.mxu1 %v349_v0  ;;  %v330_v1 = vld [vmem:[%s493_s1] sm:$0xff]   ;;  %v331_v2 = vld [vmem:[%s493_s1 + $0x8] sm:$0xff]   ;;  %v332_v3 = vld [vmem:[%s493_s1 + $0x10] sm:$0xff]  }
   0x2   :  { %328 = vset.pattern.permute.xlu0 %v349_v0  ;;  %329 = vset.pattern.permute.xlu1 %v349_v0  ;;  %v333_v4 = vld [vmem:[%s493_s1 + $0x18] sm:$0xff]   ;;  %v334_v5 = vld [vmem:[%s493_s1 + $0x20] sm:$0xff]   ;;  %v22_v7 = vld [vmem:[%s494_s0 + $0x10] sm:$0xff]  ;;  %v255_v48 = vand.u32 127, %v254_v47 }
   0x3   :  { %176 = vmatpush1.bf16.msra.mxu0 %v330_v1  ;;  %313 = vmatpush1.bf16.msra.mxu1 %v330_v1  ;;  %v346_v6 = vld [vmem:[%s494_s0 + $0x4] ss:$8 sps:$4 sm:$0xff]   ;;  %v281_v9 = vcombine.high %v22_v7, %v22_v7  ;;  %v53_v10 = vld [vmem:[%s495_s2 + $0x10] sm:$0xff]  ;;  %v337_v14 = vld [vmem:[%s493_s1 + $0x38] sm:$0xff]   ;;  %v280_v22 = vcombine.low %v22_v7, %v22_v7 }
   0x4   :  { %177 = vmatprep.subr.bf16.mxu0 %v349_v0  ;;  %300 = vmatprep.subr.bf16.mxu1 %v349_v0  ;;  %v51_v8 = vld [vmem:[%s495_s2] sm:$0xff]  ;;  %v52_v11 = vld [vmem:[%s495_s2 + $0x8] sm:$0xff]  ;;  %v336_v13 = vld [vmem:[%s493_s1 + $0x30] sm:$0xff]   ;;  %vm256_vm1 = vcmp.eq.s32.totalorder %v255_v48, 0  ;;  %vm260_vm2 = vcmp.eq.s32.totalorder %v255_v48, 1 }
   0x5   :  { %56 = vperm.xlu0 %328, %v51_v8   ;;  %296 = vmatprep.mubr.msk.bf16.mxu0 %vm168_vm0, %v346_v6  ;;  %v335_v12 = vld [vmem:[%s493_s1 + $0x28] sm:$0xff]   ;;  %v338_v15 = vld [vmem:[%s493_s1 + $0x40] sm:$0xff]   ;;  %v340_v17 = vld [vmem:[%s493_s1 + $0x50] sm:$0xff]  }
   0x6   :  { %66 = vperm.xlu1 %329, %v53_v10   ;;  %297 = vmatprep.mubr.msk.bf16.mxu1 %vm168_vm0, %v281_v9  ;;  %v339_v16 = vld [vmem:[%s493_s1 + $0x48] sm:$0xff]   ;;  %v341_v18 = vld [vmem:[%s493_s1 + $0x58] sm:$0xff]   ;;  %v342_v19 = vld [vmem:[%s493_s1 + $0x60] sm:$0xff]  }
   0x7   :  { %178 = vmatpush1.bf16.msra.mxu0 %v331_v2  ;;  %314 = vmatpush1.bf16.msra.mxu1 %v331_v2  ;;  %v343_v20 = vld [vmem:[%s493_s1 + $0x68] sm:$0xff]   ;;  %v298_v34 = vld [vmem:[%s496_s3] ss:$0 sm:$0xff] }
   0x8   :  { %179 = vmatprep.subr.bf16.mxu0 %v349_v0  ;;  %301 = vmatprep.subr.bf16.mxu1 %v349_v0  ;;  %v344_v21 = vld [vmem:[%s494_s0] ss:$8 sps:$4 sm:$0xff]  }
   0x9   :  { %61 = vperm.xlu0 %328, %v52_v11  }
   0xb   :  { %180 = vmatpush1.bf16.msra.mxu0 %v332_v3  ;;  %315 = vmatpush1.bf16.msra.mxu1 %v332_v3 }
   0xc   :  { %181 = vmatprep.subr.bf16.mxu0 %v349_v0  ;;  %302 = vmatprep.subr.bf16.mxu1 %v349_v0 }
   0xf   :  { %182 = vmatpush1.bf16.msra.mxu0 %v333_v4  ;;  %316 = vmatpush1.bf16.msra.mxu1 %v333_v4 }
  0x10   :  { %183 = vmatprep.subr.bf16.mxu0 %v349_v0  ;;  %303 = vmatprep.subr.bf16.mxu1 %v349_v0 }
  0x13   :  { %184 = vmatpush1.bf16.msra.mxu0 %v334_v5  ;;  %317 = vmatpush1.bf16.msra.mxu1 %v334_v5 }
  0x14   :  { %185 = vmatprep.subr.bf16.mxu0 %v349_v0  ;;  %304 = vmatprep.subr.bf16.mxu1 %v349_v0 }
  0x17   :  { %186 = vmatpush1.bf16.msra.mxu0 %v335_v12  ;;  %318 = vmatpush1.bf16.msra.mxu1 %v335_v12 }
  0x18   :  { %187 = vmatprep.subr.bf16.mxu0 %v349_v0  ;;  %305 = vmatprep.subr.bf16.mxu1 %v349_v0 }
  0x1b   :  { %188 = vmatpush1.bf16.msra.mxu0 %v336_v13  ;;  %319 = vmatpush1.bf16.msra.mxu1 %v336_v13 }
  0x1c   :  { %189 = vmatprep.subr.bf16.mxu0 %v349_v0  ;;  %306 = vmatprep.subr.bf16.mxu1 %v349_v0 }
  0x1f   :  { %190 = vmatpush1.bf16.msra.mxu0 %v337_v14  ;;  %320 = vmatpush1.bf16.msra.mxu1 %v337_v14 }
  0x20   :  { %191 = vmatprep.subr.bf16.mxu0 %v349_v0  ;;  %307 = vmatprep.subr.bf16.mxu1 %v349_v0 }
  0x23   :  { %192 = vmatpush1.bf16.msra.mxu0 %v338_v15  ;;  %321 = vmatpush1.bf16.msra.mxu1 %v338_v15 }
  0x24   :  { %193 = vmatprep.subr.bf16.mxu0 %v349_v0  ;;  %308 = vmatprep.subr.bf16.mxu1 %v349_v0 }
  0x27   :  { %194 = vmatpush1.bf16.msra.mxu0 %v339_v16  ;;  %322 = vmatpush1.bf16.msra.mxu1 %v339_v16 }
  0x28   :  { %195 = vmatprep.subr.bf16.mxu0 %v349_v0  ;;  %309 = vmatprep.subr.bf16.mxu1 %v349_v0 }
  0x2b   :  { %196 = vmatpush1.bf16.msra.mxu0 %v340_v17  ;;  %323 = vmatpush1.bf16.msra.mxu1 %v340_v17 }
  0x2c   :  { %197 = vmatprep.subr.bf16.mxu0 %v349_v0  ;;  %310 = vmatprep.subr.bf16.mxu1 %v349_v0 }
  0x2f   :  { %198 = vmatpush1.bf16.msra.mxu0 %v341_v18  ;;  %324 = vmatpush1.bf16.msra.mxu1 %v341_v18 }
  0x30   :  { %199 = vmatprep.subr.bf16.mxu0 %v349_v0  ;;  %311 = vmatprep.subr.bf16.mxu1 %v349_v0 }
  0x33   :  { %200 = vmatpush1.bf16.msra.mxu0 %v342_v19  ;;  %325 = vmatpush1.bf16.msra.mxu1 %v342_v19 }
  0x34   :  { %201 = vmatprep.subr.bf16.mxu0 %v349_v0  ;;  %312 = vmatprep.subr.bf16.mxu1 %v349_v0 }
  0x37   :  { %202 = vmatpush1.bf16.msra.mxu0 %v343_v20  ;;  %326 = vmatpush1.bf16.msra.mxu1 %v343_v20 }
  0x3a   :  { %208 = vmatmul.mubr.bf16.vlgmr.msra.gmra.mrb[0].mxu0 %v344_v21  ;;  %216 = vmatmul.mubr.bf16.vlgmr.msra.gmra.mrb[0].mxu1 %v280_v22 }
  0x84   :  { %v57_v23 = vpop.permute.xlu0 %56 }
  0x85   :  { %v67_v24 = vpop.permute.xlu1 %66 }
  0x88   :  { %v62_v25 = vpop.permute.xlu0 %61 }
 0x10d   :  { %v209_v26 = vpop.f32.mrb[0].mxu0  ;;  %v217_v27 = vpop.f32.mrb[0].mxu1 }
 0x10e   :  { %v210_v28 = vadd.f32 %v209_v26, %v57_v23  ;;  %v218_v29 = vadd.f32 %v217_v27, %v67_v24  ;;  %v211_v30 = vpop.f32.mrb[1].mxu0  ;;  %v219_v31 = vpop.f32.mrb[1].mxu1 }
 0x10f   :  { %v212_v32 = vpop.f32.mrb[2].mxu0  ;;  %v220_v33 = vpop.f32.mrb[2].mxu1 }
 0x110   :  { %v223_v35 = vmax.f32 %v210_v28, 0.0  ;;  %v225_v36 = vmax.f32 %v218_v29, 0.0  ;;  %v213_v37 = vadd.f32 %v212_v32, %v62_v25  ;;  %v214_v38 = vpop.f32.mrb[3].mxu0  ;;  %v221_v39 = vpop.f32.mrb[3].mxu1 }
 0x112   :  { %226 = vst [vmem:[%s497_s4] sm:$0xff] %v223_v35  ;;  %228 = vst [vmem:[%s497_s4 + $0x10] sm:$0xff] %v225_v36  ;;  %v224_v40 = vmax.f32 %v213_v37, 0.0  ;;  %v238_v41 = vmul.f32 %v298_v34, %v225_v36  ;;  %v236_v42 = vmul.f32 %v298_v34, %v223_v35 }
 0x114   :  { %227 = vst [vmem:[%s497_s4 + $0x8] sm:$0xff] %v224_v40  ;;  %243 = vadd.xlane.f32.xlu0 %v238_v41  ;;  %239 = vadd.xlane.f32.xlu1 %v236_v42  ;;  %v237_v43 = vmul.f32 %v298_v34, %v224_v40  ;;  %v245_v44 = vmul.f32 %v236_v42, %v236_v42 }
 0x115   :  { %v247_v46 = vmul.f32 %v238_v41, %v238_v41 }
 0x116   :  { %v246_v45 = vmul.f32 %v237_v43, %v237_v43 }
 0x118   :  { %241 = vadd.xlane.f32.xlu0 %v237_v43  ;;  %248 = vadd.xlane.f32.xlu1 %v245_v44 }
 0x11c   :  { %250 = vadd.xlane.f32.xlu0 %v246_v45  ;;  %252 = vadd.xlane.f32.xlu1 %v247_v46 }
 0x1a1   :  { %v244_v49 = vpop.xlane.xlu0 %243  ;;  %v240_v50 = vpop.xlane.xlu1 %239 }
 0x1a2   :  { %v257_v53 = vsel %vm256_vm1, %v240_v50, 0.0  ;;  %v259_v58 = vsel %vm256_vm1, %v244_v49, 0.0 }
 0x1a5   :  { %v242_v51 = vpop.xlane.xlu0 %241  ;;  %v249_v52 = vpop.xlane.xlu1 %248 }
 0x1a6   :  { %v261_v54 = vsel %vm260_vm2, %v249_v52, 0.0  ;;  %v258_v59 = vsel %vm256_vm1, %v242_v51, 0.0 }
 0x1a7   :  { %v264_v55 = vadd.f32 %v261_v54, %v257_v53 }
 0x1a9   :  { %267 = vst [vmem:[%s498_s5] sm:$0xff] %v264_v55  ;;  %v251_v56 = vpop.xlane.xlu0 %250  ;;  %v253_v57 = vpop.xlane.xlu1 %252 }
 0x1aa   :  { %v262_v60 = vsel %vm260_vm2, %v251_v56, 0.0  ;;  %v263_v61 = vsel %vm260_vm2, %v253_v57, 0.0 }
 0x1ab   :  { %v265_v62 = vadd.f32 %v262_v60, %v258_v59  ;;  %v266_v63 = vadd.f32 %v263_v61, %v259_v58 }
 0x1ad   :  { %268 = vst [vmem:[%s498_s5 + $0x8] sm:$0xff] %v265_v62  ;;  %269 = vst [vmem:[%s498_s5 + $0x10] sm:$0xff] %v266_v63 }

// kernel: conv_input_model.15
= control target key start
LH: loop header
LB: loop body
LE: loop exit
PB: predicated region body
PF: predicated region fallthrough
CT: control target
= control target key end

     0   :  { %v69_v0 = vmov 0   ;;  %s126_s1 = inlined_call_operand.vmem [shape: f32[24,1], index: 1, kind: input, shape index: {}]   ;;  %s127_s2 = inlined_call_operand.vmem [shape: f32[24,1], index: 2, kind: input, shape index: {}]   ;;  %s128_s0 = inlined_call_operand.vmem [shape: f32[24,128], index: 0, kind: input, shape index: {}]   ;;  %s129_s3 = inlined_call_operand.vmem [shape: f32[24,128], index: 3, kind: output, shape index: {}]  }
   0x1   :  { %68 = vset.pattern.permute.xlu1 %v69_v0  ;;  %67 = vset.pattern.permute.xlu0 %v69_v0  ;;  %v19_v1 = vld [vmem:[%s126_s1 + $0x10] sm:$0xff]  ;;  %v17_v2 = vld [vmem:[%s126_s1] sm:$0xff]  ;;  %v18_v4 = vld [vmem:[%s126_s1 + $0x8] sm:$0xff] }
   0x2   :  { %32 = vperm.xlu1 %68, %v19_v1   ;;  %22 = vperm.xlu0 %67, %v17_v2   ;;  %v38_v3 = vld [vmem:[%s127_s2] sm:$0xff]  ;;  %v40_v5 = vld [vmem:[%s127_s2 + $0x10] sm:$0xff]  ;;  %v39_v6 = vld [vmem:[%s127_s2 + $0x8] sm:$0xff] }
   0x3   :  { %v14_v9 = vld [vmem:[%s128_s0] sm:$0xff]  ;;  %v16_v11 = vld [vmem:[%s128_s0 + $0x10] sm:$0xff]  ;;  %v15_v14 = vld [vmem:[%s128_s0 + $0x8] sm:$0xff] }
   0x6   :  { %43 = vperm.xlu1 %68, %v38_v3   ;;  %27 = vperm.xlu0 %67, %v18_v4  }
   0xa   :  { %53 = vperm.xlu1 %68, %v40_v5   ;;  %48 = vperm.xlu0 %67, %v39_v6  }
  0x81   :  { %v33_v7 = vpop.permute.xlu1 %32  ;;  %v23_v8 = vpop.permute.xlu0 %22 }
  0x82   :  { %v35_v10 = vmul.f32 %v23_v8, %v14_v9  ;;  %v37_v16 = vmul.f32 %v33_v7, %v16_v11 }
  0x85   :  { %v44_v12 = vpop.permute.xlu1 %43  ;;  %v28_v13 = vpop.permute.xlu0 %27 }
  0x86   :  { %v56_v15 = vadd.f32 %v44_v12, %v35_v10  ;;  %v36_v17 = vmul.f32 %v28_v13, %v15_v14 }
  0x88   :  { %59 = vst [vmem:[%s129_s3] sm:$0xff] %v56_v15 }
  0x89   :  { %v54_v18 = vpop.permute.xlu1 %53  ;;  %v49_v19 = vpop.permute.xlu0 %48 }
  0x8a   :  { %v58_v20 = vadd.f32 %v54_v18, %v37_v16  ;;  %v57_v21 = vadd.f32 %v49_v19, %v36_v17 }
  0x8c   :  { %61 = vst [vmem:[%s129_s3 + $0x10] sm:$0xff] %v58_v20  ;;  %60 = vst [vmem:[%s129_s3 + $0x8] sm:$0xff] %v57_v21 }

</bundles_post_ra>
